<compile_context>
chip_gen: v6e
topology: v6e:2x2x1
jax: 0.10.0
libtpu: 0.0.40
codegen_flags: <defaults>
</compile_context>

<pallas_src>
import functools

import jax
import jax.numpy as jnp
from jax.experimental import pallas as pl
from jax.experimental.pallas import tpu as pltpu


def _cdiv(a, b):
    return -(-a // b)


def _round_up(value, multiple):
    return ((value + multiple - 1) // multiple) * multiple


def _pad_axis(a, target, axis):
    amount = target - a.shape[axis]
    if amount == 0:
        return a
    widths = [(0, 0)] * a.ndim
    widths[axis] = (0, amount)
    return jnp.pad(a, widths)


def _vmem_budget_bytes():
    """~55% of physical VMEM: ~35 MiB on v7x (64 MiB), ~70 MiB on v5e/v6e (128 MiB)."""
    phys = 64 * 2 ** 20  # conservative fallback = v7x physical per TensorCore
    try:
        info = pltpu.get_tpu_info()
        phys = int(getattr(info, "vmem_capacity_bytes", phys)) or phys
    except Exception:
        pass
    return int(0.55 * phys)


def _int8_mxu_available():
    """v5e/v6e MXUs have a native int8 path; v7x is bf16/fp8 only."""
    try:
        kind = jax.devices()[0].device_kind.lower()
    except Exception:
        return False
    return ("v5" in kind) or ("v6" in kind)


def _tea_kernel(x_ref, w_ref, b_ref, o_ref, *, acc_dtype):
    """One (b_tile, n_tile) output block: xq @ Wq + bq (quantization pre-applied)."""
    acc = jnp.dot(x_ref[...], w_ref[...], preferred_element_type=acc_dtype)  # MXU
    o_ref[...] = (acc.astype(jnp.float32) + b_ref[...]).astype(o_ref.dtype)


def tea_forward(x, connections, bias, *,
                round_input=True, round_connections=True,
                round_bias=True, clip_connections=True,
                max_abs_input=None, out_dtype=jnp.float32,
                tile_m=512, tile_n=512):
    """Fused quantized dense layer: round(x) @ quant(W) + quant(b), on TPU.

    max_abs_input: optional known bound on |round(x)|.  <=127 on v5e/v6e enables
    the int8 MXU path; >256 forces f32 compute (bf16 would no longer be exact).
    """
    B, K = x.shape
    K2, N = connections.shape
    assert K == K2
    bias = jnp.asarray(bias).reshape(1, N)

    # ---- one-time weight / bias quantization (outside the grid loop) --------
    w = connections.astype(jnp.float32)
    if round_connections:
        w = jnp.round(w)
    if clip_connections:
        w = jnp.clip(w, -1.0, 1.0)            # TrueNorth-style synapse clipping
    b = bias.astype(jnp.float32)
    if round_bias:
        b = jnp.round(b)

    quantized = round_input and round_connections and clip_connections
    use_int8 = (quantized and max_abs_input is not None
                and max_abs_input <= 127 and _int8_mxu_available())
    use_bf16 = (quantized and not use_int8
                and (max_abs_input is None or max_abs_input <= 256))
    if use_int8:
        compute_dtype, acc_dtype = jnp.int8, jnp.int32
    elif use_bf16:
        compute_dtype, acc_dtype = jnp.bfloat16, jnp.float32
    else:
        compute_dtype, acc_dtype = jnp.float32, jnp.float32
    w = w.astype(compute_dtype)

    # Fuse input rounding + narrow cast into the wrapper's existing full pass
    # over x (the pad below): halves streamed-x HBM/VMEM bytes vs. f32.
    xq = jnp.round(x) if round_input else x
    xq = xq.astype(compute_dtype)

    x_bytes = jnp.dtype(compute_dtype).itemsize
    w_bytes = x_bytes
    o_bytes = jnp.dtype(out_dtype).itemsize

    # ---- tile derivation under the per-generation VMEM budget ---------------
    K_pad = _round_up(K, 128)
    budget = _vmem_budget_bytes()
    b_tile = min(tile_m, _round_up(B, 8))
    n_tile = min(tile_n, _round_up(N, 128))

    def _x_cost(bt):
        return 2 * bt * K_pad * x_bytes                   # double-buffered x tile

    def _w_cost(nt):
        return 2 * K_pad * nt * w_bytes                   # double-buffered W tile

    def _usage(bt, nt):
        # bias occupies an 8-sublane-padded (8, n_tile) f32 VMEM tile
        return _x_cost(bt) + _w_cost(nt) + 2 * 8 * nt * 4 + 2 * bt * nt * o_bytes

    while _usage(b_tile, n_tile) > budget and (b_tile > 8 or n_tile > 128):
        if b_tile > 8 and (_x_cost(b_tile) >= _w_cost(n_tile) or n_tile <= 128):
            b_tile = max(8, _round_up(b_tile // 2, 8))
        else:
            n_tile = max(128, _round_up(n_tile // 2, 128))
    # TODO(synk): if _usage still exceeds budget here (very large fan-in K), add
    # a K grid axis ("arbitrary", last) with an f32 VMEM accumulator + pl.when.

    # Balance tiles so the final tile is not mostly zero padding.
    b_tile = min(b_tile, _round_up(_cdiv(B, _cdiv(B, b_tile)), 8))
    n_tile = min(n_tile, _round_up(_cdiv(N, _cdiv(N, n_tile)), 128))

    B_pad = _round_up(B, b_tile)
    N_pad = _round_up(N, n_tile)

    # Zero-pad AFTER round/clip so padded rows/cols contribute exactly zero.
    x_p = _pad_axis(_pad_axis(xq, B_pad, 0), K_pad, 1)
    w_p = _pad_axis(_pad_axis(w, K_pad, 0), N_pad, 1)
    b_p = _pad_axis(b, N_pad, 1)

    grid_m = B_pad // b_tile
    grid_n = N_pad // n_tile

    # Grid order: put the operand with the larger would-be refetch traffic on
    # the OUTER axis so it stays resident across the inner loop.
    swap = (grid_m > 1 and grid_n > 1 and
            (K_pad * N_pad * w_bytes) * (grid_m - 1)
            > (B_pad * K_pad * x_bytes) * (grid_n - 1))
    if swap:
        grid = (grid_n, grid_m)
        x_map = lambda j, i: (i, 0)
        w_map = lambda j, i: (0, j)
        b_map = lambda j, i: (0, j)
        o_map = lambda j, i: (i, j)
    else:
        grid = (grid_m, grid_n)
        x_map = lambda i, j: (i, 0)
        w_map = lambda i, j: (0, j)
        b_map = lambda i, j: (0, j)
        o_map = lambda i, j: (i, j)

    vmem_limit = int(min(budget, max(2 * _usage(b_tile, n_tile), 16 * 2 ** 20)))

    kernel = functools.partial(_tea_kernel, acc_dtype=acc_dtype)

    out_p = pl.pallas_call(
        kernel,
        out_shape=jax.ShapeDtypeStruct((B_pad, N_pad), out_dtype),
        grid_spec=pltpu.PrefetchScalarGridSpec(
            num_scalar_prefetch=0,
            grid=grid,
            in_specs=[
                pl.BlockSpec((b_tile, K_pad), x_map),   # quantized-x tile
                pl.BlockSpec((K_pad, n_tile), w_map),   # quantized-W tile
                pl.BlockSpec((1, n_tile), b_map),       # bias tile (f32)
            ],
            out_specs=pl.BlockSpec((b_tile, n_tile), o_map),
        ),
        compiler_params=pltpu.CompilerParams(
            dimension_semantics=("parallel", "parallel"),
            vmem_limit_bytes=vmem_limit),
    )(x_p, w_p, b_p)

    return out_p[:B, :N]


def tea_reference(x, connections, bias, *,
                  round_input=True, round_connections=True,
                  round_bias=True, clip_connections=True):
    """Pure-JAX (f32) reference of the same semantics, for verification."""
    if round_input:
        x = jnp.round(x)
    w = connections
    if round_connections:
        w = jnp.round(w)
    if clip_connections:
        w = jnp.clip(w, -1.0, 1.0)
    b = bias
    if round_bias:
        b = jnp.round(b)
    return x @ w + b


if __name__ == "__main__":
    # Small, deterministic problem.  B=192 / K=100 / UNITS=48 exercise the
    # padding paths (K->128, N->128); with the balanced 512-default tiles the
    # whole problem collapses to a single grid step (b_tile=192, n_tile=128).
    B, K, UNITS = 192, 100, 48

    key = jax.random.PRNGKey(0)
    kx, kw, kb = jax.random.split(key, 3)

    # Inputs look like integer-ish spike counts plus noise; weights in [-2, 2]
    # so rounding / clipping actually does something.
    x = jax.random.uniform(kx, (B, K), jnp.float32, minval=0.0, maxval=4.0)
    connections = jax.random.uniform(kw, (K, UNITS), jnp.float32,
                                     minval=-2.0, maxval=2.0)
    bias = jax.random.uniform(kb, (1, UNITS), jnp.float32,
                              minval=-3.0, maxval=3.0)

    out = jax.block_until_ready(tea_forward(x, connections, bias))
    ref = tea_reference(x, connections, bias)

    assert out.shape == (B, UNITS)
    assert jnp.allclose(out, ref, atol=1e-5, rtol=1e-5), "mismatch vs reference"

    # TODO(synk): the upstream forward() body is empty (returns an undefined
    # `outputs`); any post-affine activation / thresholding is unspecified and
    # not implemented here.
    print("KERNEL_OK")
</pallas_src>

<mosaic_0001>
module attributes {stable_mosaic.version = 11 : i64} {
  func.func @_tea_kernel(%arg0: i32, %arg1: i32, %arg2: memref<192x128xbf16, #tpu.memory_space<vmem>>, %arg3: memref<128x128xbf16, #tpu.memory_space<vmem>>, %arg4: memref<1x128xf32, #tpu.memory_space<vmem>>, %arg5: memref<192x128xf32, #tpu.memory_space<vmem>>) attributes {dimension_semantics = [#tpu.dimension_semantics<parallel>, #tpu.dimension_semantics<parallel>], iteration_bounds = array<i64: 1, 1>, scalar_prefetch = 0 : i64, scratch_operands = 0 : i64, tpu.core_type = #tpu.core_type<tc>, window_params = [{transform_indices = @transform_0, window_bounds = array<i64: 192, 128>}, {transform_indices = @transform_1, window_bounds = array<i64: 128, 128>}, {transform_indices = @transform_2, window_bounds = array<i64: 1, 128>}, {transform_indices = @transform_3, window_bounds = array<i64: 192, 128>}]} {
    %c0 = arith.constant 0 : index
    %c0_0 = arith.constant 0 : index
    %0 = vector.load %arg2[%c0, %c0_0] : memref<192x128xbf16, #tpu.memory_space<vmem>>, vector<192x128xbf16>
    %c0_1 = arith.constant 0 : index
    %c0_2 = arith.constant 0 : index
    %1 = vector.load %arg3[%c0_1, %c0_2] : memref<128x128xbf16, #tpu.memory_space<vmem>>, vector<128x128xbf16>
    %cst = arith.constant dense<0.000000e+00> : vector<192x128xf32>
    %2 = tpu.matmul %0, %1, %cst {dimension_numbers = #tpu.dot_dimension_numbers<[1], [0], [0], [1], [0, 0, 1, 1], [], []>} : vector<192x128xbf16>, vector<128x128xbf16>, vector<192x128xf32> -> vector<192x128xf32>
    %c0_3 = arith.constant 0 : index
    %c0_4 = arith.constant 0 : index
    %3 = vector.load %arg4[%c0_3, %c0_4] : memref<1x128xf32, #tpu.memory_space<vmem>>, vector<1x128xf32>
    %4 = vector.broadcast %3 : vector<1x128xf32> to vector<192x128xf32>
    %5 = arith.addf %2, %4 : vector<192x128xf32>
    %c0_5 = arith.constant 0 : index
    %c0_6 = arith.constant 0 : index
    %6 = vector.load %arg5[%c0_5, %c0_6] : memref<192x128xf32, #tpu.memory_space<vmem>>, vector<192x128xf32>
    tpu.vector_store %arg5[%c0_5, %c0_6], %5 {strides = array<i32>} : memref<192x128xf32, #tpu.memory_space<vmem>>, vector<192x128xf32>,
    return
  }
  func.func @transform_0(%arg0: i32, %arg1: i32) -> (i32, i32) {
    %c0_i32 = arith.constant 0 : i32
    %c0_i32_0 = arith.constant 0 : i32
    return %arg0, %c0_i32 : i32, i32
  }
  func.func @transform_1(%arg0: i32, %arg1: i32) -> (i32, i32) {
    %c0_i32 = arith.constant 0 : i32
    %c0_i32_0 = arith.constant 0 : i32
    return %c0_i32, %arg1 : i32, i32
  }
  func.func @transform_2(%arg0: i32, %arg1: i32) -> (i32, i32) {
    %c0_i32 = arith.constant 0 : i32
    %c0_i32_0 = arith.constant 0 : i32
    return %c0_i32, %arg1 : i32, i32
  }
  func.func @transform_3(%arg0: i32, %arg1: i32) -> (i32, i32) {
    %c0_i32 = arith.constant 0 : i32
    return %arg0, %arg1 : i32, i32
  }
}

</mosaic_0001>

<bundles_post_ra>
// kernel: tpu_custom_call.1
= control target key start
LH: loop header
LB: loop body
LE: loop exit
PB: predicated region body
PF: predicated region fallthrough
CT: control target
= control target key end

     0   :  { %8 = vsyncpa [#allocation3], 0  ;;  %s637_s0 = inlined_call_operand.hbm [shape: bf16[192,128], index: 0, kind: input, shape index: {}]   ;;  %s638_s1 = inlined_call_operand.hbm [shape: bf16[128,128], index: 1, kind: input, shape index: {}]   ;;  %s639_s2 = inlined_call_operand.vmem [shape: f32[1,128], index: 2, kind: input, shape index: {}]   ;;  %s640_s3 = inlined_call_operand.hbm [shape: f32[192,128], index: 3, kind: output, shape index: {}]  }
   0x1   :  { %9 = vsyncpa [#allocation6], 0 }
   0x2   :  { %10 = vsyncpa [#allocation4], 0  ;;  %s572_s12 = smov [#allocation2]  }
   0x3   :  { %s16_s13 = sshll.u32 %s572_s12, 4  ;;  %s17_s13 = int_to_ptr.vmem [resolvable:$true] %s16_s13 }
   0x4   :  { %s514_s14 = scalar_lea.vmem %s17_s13, 1536  ;;  %p519_p1 = scmp.lt.s32.totalorder %s17_s13, %s17_s13 }
   0x5   :  { %p515_p0 = scmp.ne.s32.totalorder %s17_s13, %s514_s14  ;;  %p520_p2 = scmp.lt.s32.totalorder %s514_s14, %s514_s14 }
   0x7   :  { %p521_p3 = por %p520_p2, %p519_p1 }
   0x9   :  { %p522_p4 = pnand %p521_p3, %p515_p0 }
   0xb   :  { %525 = shalt.err (!%p522_p4)
}
   0xc   :  { %s573_s15 = smov 64   ;;  %s574_s16 = smov 4  }
   0xd   :  { %22 = dma.hbm_to_vmem [thread:$0]  %s637_s0, 1536, %s17_s13, [#allocation3], %s573_s15, %s573_s15, %s574_s16  }
   0xe   :  { %s575_s19 = smov [#allocation5]  }
   0xf   :  { %s28_s20 = sshll.u32 %s575_s19, 4  ;;  %s29_s20 = int_to_ptr.vmem [resolvable:$true] %s28_s20 }
  0x10   :  { %s534_s21 = scalar_lea.vmem %s29_s20, 1024  ;;  %p539_p6 = scmp.lt.s32.totalorder %s29_s20, %s29_s20 }
  0x11   :  { %p535_p5 = scmp.ne.s32.totalorder %s29_s20, %s534_s21  ;;  %p540_p7 = scmp.lt.s32.totalorder %s534_s21, %s534_s21 }
  0x13   :  { %p541_p8 = por %p540_p7, %p539_p6 }
  0x15   :  { %p542_p9 = pnand %p541_p8, %p535_p5 }
  0x17   :  { %545 = shalt.err (!%p542_p9)
}
  0x18   :  { %34 = dma.hbm_to_vmem [thread:$0]  %s638_s1, 1024, %s29_s20, [#allocation6], %s573_s15, %s573_s15, %s574_s16  }
  0x19   :  { %566 = dma.done.wait [#allocation3], 1536  }
  0x1a   :  { %567 = vsyncadd [#allocation3], 4294965760 }
  0x1b   :  { %568 = dma.done.wait [#allocation6], 1024  }
  0x1c   :  { %569 = vsyncadd [#allocation6], 4294966272  ;;  %v486_v0 = vld [vmem:[#allocation5 + $0x38] sm:$0xff]   ;;  %v487_v1 = vld [vmem:[#allocation5 + $0x30] sm:$0xff]  }
  0x1d   :  { %423 = vmatprep.subr.bf16.mxu0 %v486_v0  ;;  %463 = vmatprep.subr.bf16.mxu1 %v486_v0  ;;  %v488_v2 = vld [vmem:[#allocation5 + $0x28] sm:$0xff]   ;;  %v489_v3 = vld [vmem:[#allocation5 + $0x20] sm:$0xff]   ;;  %v495_v5 = vld [vmem:[#allocation2 + $0x30] sm:$0xff]  }
  0x1e   :  { %424 = vmatpush3.bf16.msra.mxu0 %v486_v0  ;;  %471 = vmatpush3.bf16.msra.mxu1 %v486_v0  ;;  %v494_v4 = vld [vmem:[#allocation2] sm:$0xff]   ;;  %v490_v6 = vld [vmem:[#allocation5 + $0x18] sm:$0xff]   ;;  %v491_v7 = vld [vmem:[#allocation5 + $0x10] sm:$0xff]  }
  0x1f   :  { %425 = vmatprep.subr.bf16.mxu0 %v487_v1  ;;  %464 = vmatprep.subr.bf16.mxu1 %v487_v1  ;;  %v492_v8 = vld [vmem:[#allocation5 + $0x8] sm:$0xff]   ;;  %v493_v9 = vld [vmem:[#allocation5] sm:$0xff]   ;;  %v497_v11 = vld [vmem:[#allocation2 + $0x38] sm:$0xff]  }
  0x20   :  { %439 = vmatprep.mubr.bf16.mxu0 %v494_v4  ;;  %451 = vmatprep.mubr.bf16.mxu1 %v495_v5  ;;  %v496_v10 = vld [vmem:[#allocation2 + $0x8] sm:$0xff]   ;;  %v498_v12 = vld [vmem:[#allocation2 + $0x10] sm:$0xff]   ;;  %v499_v13 = vld [vmem:[#allocation2 + $0x40] sm:$0xff]  }
  0x21   :  { %v500_v14 = vld [vmem:[#allocation2 + $0x18] sm:$0xff]   ;;  %v501_v15 = vld [vmem:[#allocation2 + $0x48] sm:$0xff]   ;;  %v502_v16 = vld [vmem:[#allocation2 + $0x20] sm:$0xff]  }
  0x22   :  { %426 = vmatpush3.bf16.msra.mxu0 %v487_v1  ;;  %472 = vmatpush3.bf16.msra.mxu1 %v487_v1  ;;  %v503_v17 = vld [vmem:[#allocation2 + $0x50] sm:$0xff]   ;;  %v504_v18 = vld [vmem:[#allocation2 + $0x28] sm:$0xff]   ;;  %v505_v19 = vld [vmem:[#allocation2 + $0x58] sm:$0xff]  }
  0x23   :  { %427 = vmatprep.subr.bf16.mxu0 %v488_v2  ;;  %465 = vmatprep.subr.bf16.mxu1 %v488_v2  ;;  %v608_v20 = vld [vmem:[%s639_s2] ss:$0 sm:$0xff]  ;;  %s576_s2 = smov [#allocation7]  }
  0x24   :  { %s369_s24 = sshll.u32 %s576_s2, 4  ;;  %s370_s24 = int_to_ptr.vmem [resolvable:$true] %s369_s24 }
  0x25   :  { %s546_s25 = scalar_lea.vmem %s370_s24, 3072  ;;  %p551_p11 = scmp.lt.s32.totalorder %s370_s24, %s370_s24 }
  0x26   :  { %428 = vmatpush3.bf16.msra.mxu0 %v488_v2  ;;  %473 = vmatpush3.bf16.msra.mxu1 %v488_v2  ;;  %p547_p10 = scmp.ne.s32.totalorder %s370_s24, %s546_s25  ;;  %p552_p12 = scmp.lt.s32.totalorder %s546_s25, %s546_s25 }
  0x27   :  { %429 = vmatprep.subr.bf16.mxu0 %v489_v3  ;;  %466 = vmatprep.subr.bf16.mxu1 %v489_v3 }
  0x28   :  { %p553_p13 = por %p552_p12, %p551_p11 }
  0x2a   :  { %430 = vmatpush3.bf16.msra.mxu0 %v489_v3  ;;  %474 = vmatpush3.bf16.msra.mxu1 %v489_v3  ;;  %p554_p0 = pnand %p553_p13, %p547_p10 }
  0x2b   :  { %431 = vmatprep.subr.bf16.mxu0 %v490_v6  ;;  %467 = vmatprep.subr.bf16.mxu1 %v490_v6 }
  0x2e   :  { %432 = vmatpush3.bf16.msra.mxu0 %v490_v6  ;;  %475 = vmatpush3.bf16.msra.mxu1 %v490_v6 }
  0x2f   :  { %433 = vmatprep.subr.bf16.mxu0 %v491_v7  ;;  %468 = vmatprep.subr.bf16.mxu1 %v491_v7 }
  0x32   :  { %434 = vmatpush3.bf16.msra.mxu0 %v491_v7  ;;  %476 = vmatpush3.bf16.msra.mxu1 %v491_v7 }
  0x33   :  { %435 = vmatprep.subr.bf16.mxu0 %v492_v8  ;;  %469 = vmatprep.subr.bf16.mxu1 %v492_v8 }
  0x36   :  { %436 = vmatpush3.bf16.msra.mxu0 %v492_v8  ;;  %477 = vmatpush3.bf16.msra.mxu1 %v492_v8 }
  0x37   :  { %437 = vmatprep.subr.bf16.mxu0 %v493_v9  ;;  %470 = vmatprep.subr.bf16.mxu1 %v493_v9 }
  0x3a   :  { %438 = vmatpush3.bf16.msra.mxu0 %v493_v9  ;;  %478 = vmatpush3.bf16.msra.mxu1 %v493_v9 }
  0x3d   :  { %440 = vmatmul.mubr.bf16.vlgmr.msra.gmra.mxu0 %v496_v10  ;;  %452 = vmatmul.mubr.bf16.vlgmr.msra.gmra.mxu1 %v497_v11 }
  0x3e   :  { %443 = vmatprep.mubr.bf16.mxu0 %v498_v12  ;;  %455 = vmatprep.mubr.bf16.mxu1 %v499_v13 }
  0x45   :  { %444 = vmatmul.mubr.bf16.gmra.mxu0 %v500_v14  ;;  %456 = vmatmul.mubr.bf16.gmra.mxu1 %v501_v15 }
  0x46   :  { %447 = vmatprep.mubr.bf16.mxu0 %v502_v16  ;;  %459 = vmatprep.mubr.bf16.mxu1 %v503_v17 }
  0x4d   :  { %448 = vmatmul.mubr.bf16.gmra.mxu0 %v504_v18  ;;  %460 = vmatmul.mubr.bf16.gmra.mxu1 %v505_v19 }
  0xfd   :  { %v441_v21 = vpop.f32.mrf.mxu0  ;;  %v453_v22 = vpop.f32.mrf.mxu1 }
  0xfe   :  { %v254_v23 = vadd.f32 %v441_v21, %v608_v20  ;;  %v302_v24 = vadd.f32 %v453_v22, %v608_v20 }
  0xff   :  { %v245_v25 = vpop.f32.mrf.mxu0  ;;  %v293_v26 = vpop.f32.mrf.mxu1 }
 0x100   :  { %342 = vst [vmem:[#allocation7 + $0x10] sm:$0xff] %v254_v23  ;;  %354 = vst [vmem:[#allocation7 + $0x70] sm:$0xff] %v302_v24  ;;  %v246_v27 = vadd.f32 %v608_v20, %v245_v25  ;;  %v294_v28 = vadd.f32 %v608_v20, %v293_v26 }
 0x101   :  { %v442_v29 = vpop.f32.mrf.mxu0  ;;  %v454_v30 = vpop.f32.mrf.mxu1 }
 0x102   :  { %340 = vst [vmem:[#allocation7] sm:$0xff] %v246_v27  ;;  %352 = vst [vmem:[#allocation7 + $0x60] sm:$0xff] %v294_v28  ;;  %v257_v31 = vadd.f32 %v442_v29, %v608_v20  ;;  %v305_v32 = vadd.f32 %v454_v30, %v608_v20 }
 0x103   :  { %v248_v33 = vpop.f32.mrf.mxu0  ;;  %v296_v34 = vpop.f32.mrf.mxu1 }
 0x104   :  { %343 = vst [vmem:[#allocation7 + $0x18] sm:$0xff] %v257_v31  ;;  %355 = vst [vmem:[#allocation7 + $0x78] sm:$0xff] %v305_v32  ;;  %v249_v35 = vadd.f32 %v608_v20, %v248_v33  ;;  %v297_v36 = vadd.f32 %v608_v20, %v296_v34 }
 0x105   :  { %v445_v37 = vpop.f32.mrf.mxu0  ;;  %v457_v38 = vpop.f32.mrf.mxu1 }
 0x106   :  { %341 = vst [vmem:[#allocation7 + $0x8] sm:$0xff] %v249_v35  ;;  %353 = vst [vmem:[#allocation7 + $0x68] sm:$0xff] %v297_v36  ;;  %v270_v39 = vadd.f32 %v445_v37, %v608_v20  ;;  %v318_v40 = vadd.f32 %v457_v38, %v608_v20 }
 0x107   :  { %v261_v41 = vpop.f32.mrf.mxu0  ;;  %v309_v42 = vpop.f32.mrf.mxu1 }
 0x108   :  { %346 = vst [vmem:[#allocation7 + $0x30] sm:$0xff] %v270_v39  ;;  %358 = vst [vmem:[#allocation7 + $0x90] sm:$0xff] %v318_v40  ;;  %v262_v43 = vadd.f32 %v608_v20, %v261_v41  ;;  %v310_v44 = vadd.f32 %v608_v20, %v309_v42 }
 0x109   :  { %v446_v45 = vpop.f32.mrf.mxu0  ;;  %v458_v46 = vpop.f32.mrf.mxu1 }
 0x10a   :  { %344 = vst [vmem:[#allocation7 + $0x20] sm:$0xff] %v262_v43  ;;  %356 = vst [vmem:[#allocation7 + $0x80] sm:$0xff] %v310_v44  ;;  %v273_v47 = vadd.f32 %v446_v45, %v608_v20  ;;  %v321_v48 = vadd.f32 %v458_v46, %v608_v20 }
 0x10b   :  { %v264_v49 = vpop.f32.mrf.mxu0  ;;  %v312_v50 = vpop.f32.mrf.mxu1 }
 0x10c   :  { %347 = vst [vmem:[#allocation7 + $0x38] sm:$0xff] %v273_v47  ;;  %359 = vst [vmem:[#allocation7 + $0x98] sm:$0xff] %v321_v48  ;;  %v265_v51 = vadd.f32 %v608_v20, %v264_v49  ;;  %v313_v52 = vadd.f32 %v608_v20, %v312_v50 }
 0x10d   :  { %v449_v53 = vpop.f32.mrf.mxu0  ;;  %v461_v54 = vpop.f32.mrf.mxu1 }
 0x10e   :  { %345 = vst [vmem:[#allocation7 + $0x28] sm:$0xff] %v265_v51  ;;  %357 = vst [vmem:[#allocation7 + $0x88] sm:$0xff] %v313_v52  ;;  %v286_v55 = vadd.f32 %v449_v53, %v608_v20  ;;  %v334_v56 = vadd.f32 %v461_v54, %v608_v20 }
 0x10f   :  { %v277_v57 = vpop.f32.mrf.mxu0  ;;  %v325_v58 = vpop.f32.mrf.mxu1 }
 0x110   :  { %350 = vst [vmem:[#allocation7 + $0x50] sm:$0xff] %v286_v55  ;;  %362 = vst [vmem:[#allocation7 + $0xb0] sm:$0xff] %v334_v56  ;;  %v278_v59 = vadd.f32 %v608_v20, %v277_v57  ;;  %v326_v60 = vadd.f32 %v608_v20, %v325_v58 }
 0x111   :  { %v450_v61 = vpop.f32.mrf.mxu0  ;;  %v462_v62 = vpop.f32.mrf.mxu1 }
 0x112   :  { %348 = vst [vmem:[#allocation7 + $0x40] sm:$0xff] %v278_v59  ;;  %360 = vst [vmem:[#allocation7 + $0xa0] sm:$0xff] %v326_v60  ;;  %v289_v63 = vadd.f32 %v450_v61, %v608_v20  ;;  %v337_v0 = vadd.f32 %v462_v62, %v608_v20 }
 0x113   :  { %v280_v1 = vpop.f32.mrf.mxu0  ;;  %v328_v2 = vpop.f32.mrf.mxu1 }
 0x114   :  { %351 = vst [vmem:[#allocation7 + $0x58] sm:$0xff] %v289_v63  ;;  %363 = vst [vmem:[#allocation7 + $0xb8] sm:$0xff] %v337_v0  ;;  %v281_v3 = vadd.f32 %v608_v20, %v280_v1  ;;  %v329_v4 = vadd.f32 %v608_v20, %v328_v2 }
 0x116   :  { %349 = vst [vmem:[#allocation7 + $0x48] sm:$0xff] %v281_v3  ;;  %361 = vst [vmem:[#allocation7 + $0xa8] sm:$0xff] %v329_v4 }
 0x117   :  { %557 = shalt.err (!%p554_p0)
}
 0x118   :  { %s577_s26 = smov 128   ;;  %s578_s27 = smov 8  }
 0x119   :  { %375 = dma.vmem_to_hbm [thread:$0]  %s370_s24, 3072, %s640_s3, [#allocation4], %s577_s26, %s577_s26, %s578_s27  }
 0x11a   :  { %570 = dma.done.wait [#allocation4], 3072  }
 0x11b   :  { %571 = vsyncadd [#allocation4], 4294964224 }
 0x11c   :  { %379 = vsyncpa [#allocation3], 1 }
 0x11d   :  { %380 = vsyncpa [#allocation6], 1 }
 0x11e   :  { %381 = vsyncpa [#allocation4], 1 }

</bundles_post_ra>
